<compile_context>
chip_gen: v7x
topology: tpu7x:2x2x1
jax: 0.10.0
libtpu: 0.0.40
codegen_flags: <defaults>
</compile_context>

<pallas_src>
import jax
import jax.numpy as jnp
from jax.experimental import pallas as pl
from jax.experimental.pallas import tpu as pltpu


def linear_kernel(x_ref, w_ref, o_ref):
    # x_ref: (B, 4) = [x | 1], w_ref: (4, 8) = [W^T ; bias].
    # Single MXU matmul in its native [K, N] RHS layout; bias is folded in.
    o_ref[...] = jnp.dot(
        x_ref[...], w_ref[...], preferred_element_type=jnp.float32
    ).astype(o_ref.dtype)


@jax.jit
def model_forward(x, weight, bias):
    """x: (B, 3) f32; weight: (8, 3) f32 (torch layout); bias: (8,) f32."""
    B = x.shape[0]
    # Fold bias into the matmul and pre-transpose the weight (wrapper-side,
    # fully inside the jit so XLA fuses these tiny preps):
    #   x_aug = [x | 1]          -> (B, 4)
    #   w_aug = [W^T ; bias]     -> (4, 8)
    #   x_aug @ w_aug == x @ W^T + bias
    x_aug = jnp.concatenate([x, jnp.ones((B, 1), dtype=x.dtype)], axis=1)
    w_aug = jnp.concatenate([weight.T, bias[None, :]], axis=0)

    return pl.pallas_call(
        linear_kernel,
        out_shape=jax.ShapeDtypeStruct((B, 8), jnp.float32),
        # No grid: whole arrays, auto-DMA'd once into VMEM (2 inputs, 1 output).
        in_specs=[
            pl.BlockSpec(memory_space=pltpu.MemorySpace.VMEM),  # x_aug (B, 4)
            pl.BlockSpec(memory_space=pltpu.MemorySpace.VMEM),  # w_aug (4, 8)
        ],
        out_specs=pl.BlockSpec(memory_space=pltpu.MemorySpace.VMEM),
    )(x_aug, w_aug)


if __name__ == "__main__":
    key = jax.random.PRNGKey(0)
    kx, kw, kb = jax.random.split(key, 3)

    # Input per reference module: x = torch.randn(1, 3)
    x = jax.random.normal(kx, (1, 3), dtype=jnp.float32)

    # Deterministic Linear(3, 8) params (PyTorch-style uniform(-1/sqrt(3), 1/sqrt(3)))
    bound = 1.0 / jnp.sqrt(3.0)
    weight = jax.random.uniform(kw, (8, 3), minval=-bound, maxval=bound,
                                dtype=jnp.float32)
    bias = jax.random.uniform(kb, (8,), minval=-bound, maxval=bound,
                              dtype=jnp.float32)

    out = model_forward(x, weight, bias)
    jax.block_until_ready(out)

    # Reference check in plain JAX
    ref = x @ weight.T + bias
    assert out.shape == (1, 8)
    assert jnp.allclose(out, ref, atol=1e-5), "mismatch vs reference"

    print("KERNEL_OK")
</pallas_src>

<mosaic_0001>
module attributes {stable_mosaic.version = 11 : i64} {
  func.func @linear_kernel(%arg0: memref<1x4xf32, #tpu.memory_space<vmem>>, %arg1: memref<4x8xf32, #tpu.memory_space<vmem>>, %arg2: memref<1x8xf32, #tpu.memory_space<vmem>>) attributes {dimension_semantics = [], scalar_prefetch = 0 : i64, scratch_operands = 0 : i64, tpu.core_type = #tpu.core_type<tc>} {
    %c0 = arith.constant 0 : index
    %c0_0 = arith.constant 0 : index
    %0 = vector.load %arg0[%c0, %c0_0] : memref<1x4xf32, #tpu.memory_space<vmem>>, vector<1x4xf32>
    %c0_1 = arith.constant 0 : index
    %c0_2 = arith.constant 0 : index
    %1 = vector.load %arg1[%c0_1, %c0_2] : memref<4x8xf32, #tpu.memory_space<vmem>>, vector<4x8xf32>
    %cst = arith.constant dense<0.000000e+00> : vector<1x8xf32>
    %2 = tpu.matmul %0, %1, %cst {dimension_numbers = #tpu.dot_dimension_numbers<[1], [0], [0], [1], [0, 0, 1, 1], [], []>} : vector<1x4xf32>, vector<4x8xf32>, vector<1x8xf32> -> vector<1x8xf32>
    %c0_3 = arith.constant 0 : index
    %c0_4 = arith.constant 0 : index
    %3 = vector.load %arg2[%c0_3, %c0_4] : memref<1x8xf32, #tpu.memory_space<vmem>>, vector<1x8xf32>
    tpu.vector_store %arg2[%c0_3, %c0_4], %2 {strides = array<i32>} : memref<1x8xf32, #tpu.memory_space<vmem>>, vector<1x8xf32>,
    return
  }
}

</mosaic_0001>

<bundles_post_ra>
// kernel: model_forward.1
= control target key start
LH: loop header
LB: loop body
LE: loop exit
PB: predicated region body
PF: predicated region fallthrough
CT: control target
= control target key end

     0   :  { %vm18_vm0 = vcmask 1043456   ;;  %vm14_vm1 = vcmask 31744   ;;  %v144_v1 = vmov 0.0   ;;  %vm145_vm2 = vmmov 0   ;;  %s180_s0 = inlined_call_operand.vmem [shape: f32[1,4], index: 0, kind: input, shape index: {}]   ;;  %s181_s1 = inlined_call_operand.vmem [shape: f32[4,8], index: 1, kind: input, shape index: {}]   ;;  %s182_s2 = inlined_call_operand.hbm [shape: f32[1,8], index: 2, kind: output, shape index: {}]  }
   0x1   :  { %v13_v0 = vld [vmem:[%s181_s1] sm:$0xf]  ;;  %112 = vmatprep.subr.mxu0 %v144_v1  ;;  %114 = vmatprep.mubr.msk.f32.mxu0 %vm145_vm2, %v144_v1 }
   0x2   :  { %v12_v2 = vld [vmem:[%s180_s0] sm:$0x1] }
   0x3   :  { %7 = vsyncpa [#allocation3], 0  ;;  %113 = vmatpush3.msk.msra.mxu0 %vm18_vm0, %v13_v0  ;;  %s146_s13 = smov [#allocation2]   ;;  %vm92_vm3 = vcmask 57344  }
   0x4   :  { %115 = vmatmul.mubr.msk.f32.vlgmr.msra.gmra.mrb[0].mxu0 %vm14_vm1, %v12_v2  ;;  %s100_s14 = sshll.u32 %s146_s13, 4  ;;  %s101_s14 = int_to_ptr.vmem [resolvable:$true] %s100_s14 }
   0x5   :  { %s120_s1 = scalar_lea.vmem %s101_s14, 16  ;;  %s124_s15 = scalar_lea.vmem %s101_s14, 32 }
   0x6   :  { %p121_p0 = scmp.ne.s32.totalorder %s101_s14, %s120_s1  ;;  %p125_p1 = scmp.lt.s32.totalorder %s101_s14, %s101_s14 }
   0x7   :  { %p126_p2 = scmp.lt.s32.totalorder %s124_s15, %s120_s1 }
   0x9   :  { %p127_p3 = por %p126_p2, %p125_p1 }
   0xb   :  { %p128_p4 = pnand %p127_p3, %p121_p0 }
  0xd7   :  { %v88_v3 = vpop.f32.mrb[0].mxu0 }
  0xd8   :  { %93 = vst.msk [vmem:[#allocation2] sm:$0x1] %vm92_vm3, %v88_v3  ;;  %v116_v4 = vpop.f32.mrb[1].mxu0 }
  0xd9   :  { %131 = shalt.err (!%p128_p4)
}
  0xda   :  { %s132_s17 = scalar_lea.hbm %s182_s2, 16 }
  0xdb   :  { %p133_p5 = scmp.ne.s32.totalorder %s182_s2, %s132_s17  ;;  %p136_p6 = scmp.lt.u32.totalorder %s132_s17, %s182_s2 }
  0xdd   :  { %p138_p7 = pnand %p136_p6, %p133_p5 }
  0xdf   :  { %141 = shalt.err (!%p138_p7)
}
  0xe0   :  { %103 = dma.vmem_to_hbm [thread:$0]  %s101_s14, 16, %s182_s2, [#allocation3]  }
  0xe1   :  { %142 = dma.done.wait [#allocation3], 16  }
  0xe2   :  { %143 = vsyncadd [#allocation3], 4294967280 }
  0xe3   :  { %107 = vsyncpa [#allocation3], 1 }

</bundles_post_ra>
